<compile_context>
chip_gen: v7x
topology: tpu7x:2x2x1
jax: 0.10.0
libtpu: 0.0.40
codegen_flags: <defaults>
</compile_context>

<pallas_src>
import functools

import numpy as np
import jax
import jax.numpy as jnp
from jax.experimental import pallas as pl
from jax.experimental.pallas import tpu as pltpu


# ----------------------------------------------------------------------------
# Host-side construction of crop+resize interpolation matrices (glue).
# ----------------------------------------------------------------------------
def _cubic(t, a=-0.75):
    """PyTorch bicubic (Keys) kernel with A = -0.75."""
    t = np.abs(t)
    t2, t3 = t * t, t * t * t
    return np.where(
        t <= 1.0,
        (a + 2.0) * t3 - (a + 3.0) * t2 + 1.0,
        np.where(t < 2.0, a * t3 - 5.0 * a * t2 + 8.0 * a * t - 4.0 * a, 0.0),
    )


def _crop_resize_matrix(out_size, crop_size, offset, full_size):
    """(out_size, full_size) matrix mapping a full input axis to the bicubic
    (align_corners=True) resize of input[offset:offset+crop_size]."""
    W = np.zeros((out_size, full_size), np.float32)
    for j in range(out_size):
        src = 0.0 if out_size == 1 else j * (crop_size - 1) / (out_size - 1)
        i0 = int(np.floor(src))
        frac = src - i0
        for k in range(-1, 3):
            w = float(_cubic(frac - k))
            idx = min(max(i0 + k, 0), crop_size - 1)  # border replication
            W[j, offset + idx] += w
    return W


def _pick_cutouts_per_step(cutn, cs, max_cols=2048):
    """Cutouts per grid step: prefer the smallest divisor k of cutn whose
    first-matmul width k*cs is a multiple of 128 (MXU/lane aligned); fall
    back to the largest divisor with a bounded width."""
    candidates = [k for k in range(1, cutn + 1)
                  if cutn % k == 0 and k * cs <= max_cols]
    if not candidates:
        return 1
    aligned = [k for k in candidates if (k * cs) % 128 == 0]
    if aligned:
        return min(aligned)
    return max(candidates)


# ----------------------------------------------------------------------------
# Pallas kernel: k cutouts per grid step; all N images / C channels fused.
# ----------------------------------------------------------------------------
def _cutouts_kernel(xf_ref, wh_ref, wwt_ref, o_ref, t_all, t_one,
                    *, nc, height, cs, k):
    # xf_ref  : (N*C*H, W)          bf16, resident (constant block index)
    # wh_ref  : (1, k*cs, H)        f32, this step's cutout group
    # wwt_ref : (1, W, k*cs)        bf16, this step's concatenated WW^T
    # o_ref   : (1, cs, k*nc*cs)    lane-dense per-step output slab
    # t_all   : (N*C*H, k*cs) f32   first-contraction result (scratch)
    # t_one   : (H, nc*cs)    f32   per-cutout (H, nc*cs) layout (scratch)
    ncs = nc * cs

    # Contraction over W: ONE wide-N MXU matmul for all images, channels and
    # the k cutouts of this step (bf16 x bf16, f32 accumulation).
    t_all[...] = jnp.dot(xf_ref[...], wwt_ref[0],
                         preferred_element_type=jnp.float32)

    # Contraction over H: one (cs, H) @ (H, nc*cs) dot per cutout.
    for j in range(k):                               # static, k is small
        # Gather t for cutout j into (H, nc*cs) layout with nc static
        # ref-slice copies (cheap sublane-aligned reads, no MXU involved).
        for p in range(nc):                          # static
            t_one[:, p * cs:(p + 1) * cs] = (
                t_all[p * height:(p + 1) * height, j * cs:(j + 1) * cs])
        wh_j = wh_ref[0, j * cs:(j + 1) * cs, :]     # (cs, H) f32
        y = jnp.dot(wh_j, t_one[...],
                    preferred_element_type=jnp.float32)   # (cs, nc*cs)
        # clamp_with_grad forward; cutouts concatenated on the lane axis.
        o_ref[0, :, j * ncs:(j + 1) * ncs] = (
            jnp.clip(y, 0.0, 1.0).astype(o_ref.dtype))


def make_cutouts_pallas(x, wh, wwt, cut_size, *, cutouts_per_step=None,
                        compute_dtype=jnp.bfloat16, out_dtype=jnp.float32):
    """x: (N, C, H, W) f32;  wh: (cutn, cs, H);  wwt: (cutn, W, cs)."""
    N, C, H, W = x.shape
    cutn = wh.shape[0]
    nc = N * C
    cs = cut_size

    k = (cutouts_per_step if cutouts_per_step is not None
         else _pick_cutouts_per_step(cutn, cs))
    if cutn % k != 0:
        raise ValueError(f"cutouts_per_step={k} must divide cutn={cutn}")
    G = cutn // k

    c_bytes = np.dtype(compute_dtype).itemsize
    o_bytes = np.dtype(out_dtype).itemsize

    # Inputs in the layouts the kernel wants (all cheap wrapper-side XLA ops):
    #   xf    : (N*C*H, W)      -- free contiguous reshape, bf16
    #   wh_g  : (G, k*cs, H)    -- group-major rows (j, s), f32
    #   wwt_g : (G, W, k*cs)    -- group-major cols (j, d), bf16
    xf = x.reshape(nc * H, W).astype(compute_dtype)
    wh_g = jnp.asarray(wh, jnp.float32).reshape(G, k * cs, H)
    wwt_g = (jnp.asarray(wwt).astype(compute_dtype)
             .reshape(G, k, W, cs).transpose(0, 2, 1, 3).reshape(G, W, k * cs))

    kernel = functools.partial(_cutouts_kernel, nc=nc, height=H, cs=cs, k=k)

    # VMEM budget from the actual shapes (worst case: everything 2x-buffered),
    # kept well under v7x's 64 MiB/TC for realistic shapes.
    vmem_need = (
        2 * nc * H * W * c_bytes            # resident x
        + 2 * (k * cs) * H * 4              # wh group block
        + 2 * W * (k * cs) * c_bytes        # wwt group block
        + 2 * cs * (k * nc * cs) * o_bytes  # output slab
        + nc * H * (k * cs) * 4             # t_all scratch
        + H * (nc * cs) * 4                 # t_one scratch
    )
    vmem_limit = int(min(max(2 * vmem_need, 32 * 1024 * 1024),
                         100 * 1024 * 1024))

    flops = 2 * cutn * nc * H * cs * (W + cs)
    bytes_accessed = (
        nc * H * W * c_bytes                 # x, fetched once (resident)
        + cutn * cs * H * 4                  # wh
        + cutn * W * cs * c_bytes            # wwt
        + cutn * nc * cs * cs * o_bytes      # output
    )

    out3 = pl.pallas_call(
        kernel,
        out_shape=jax.ShapeDtypeStruct((G, cs, k * nc * cs), out_dtype),
        grid_spec=pltpu.PrefetchScalarGridSpec(
            num_scalar_prefetch=0,
            grid=(G,),
            in_specs=[
                # full-array block with constant index -> fetched once,
                # kept VMEM-resident across all grid steps.
                pl.BlockSpec((nc * H, W), lambda g: (0, 0)),
                # per-step cutout-group interpolation tables (leading axis
                # blocked, last two dims full -> always a legal block shape).
                pl.BlockSpec((1, k * cs, H), lambda g: (g, 0, 0)),
                pl.BlockSpec((1, W, k * cs), lambda g: (g, 0, 0)),
            ],
            out_specs=pl.BlockSpec((1, cs, k * nc * cs), lambda g: (g, 0, 0)),
            scratch_shapes=[
                pltpu.VMEM((nc * H, k * cs), jnp.float32),
                pltpu.VMEM((H, nc * cs), jnp.float32),
            ],
        ),
        compiler_params=pltpu.CompilerParams(
            # On v7x, consider pltpu.CORE_PARALLEL here so the group axis is
            # guaranteed to shard across both TensorCores.
            dimension_semantics=("parallel",),
            vmem_limit_bytes=vmem_limit,
        ),
        cost_estimate=pl.CostEstimate(
            flops=flops, transcendentals=0, bytes_accessed=bytes_accessed),
    )(xf, wh_g, wwt_g)

    # (G, cs, k*N*C*cs) -> (cutn*N, C, cs, cs): pure relabel/transpose done by
    # XLA in the wrapper; matches torch.cat(cutouts, dim=0) ordering exactly.
    out = (out3.reshape(G, cs, k, N, C, cs)
               .transpose(0, 2, 3, 4, 1, 5)
               .reshape(cutn * N, C, cs, cs))
    return out


# ----------------------------------------------------------------------------
# Driver
# ----------------------------------------------------------------------------
if __name__ == "__main__":
    cut_size, cutn, cut_pow = 8, 4, 1.0
    N, C, H, W = 2, 4, 16, 16

    key = jax.random.PRNGKey(0)
    kx, kc = jax.random.split(key)
    # images in [0, 1] like the pipeline feeding MakeCutoutsOrig
    x = jax.random.uniform(kx, (N, C, H, W), dtype=jnp.float32)

    sideY, sideX = H, W
    max_size = min(sideX, sideY)
    min_size = min(sideX, sideY, cut_size)

    wh_list, wwt_list = [], []
    ck = kc
    for _ in range(cutn):
        ck, k1, k2, k3 = jax.random.split(ck, 4)
        u = float(jax.random.uniform(k1, ()))
        size = int(u ** cut_pow * (max_size - min_size) + min_size)
        offsetx = int(jax.random.randint(k2, (), 0, sideX - size + 1))
        offsety = int(jax.random.randint(k3, (), 0, sideY - size + 1))
        wh_list.append(_crop_resize_matrix(cut_size, size, offsety, H))      # (cs, H)
        wwt_list.append(_crop_resize_matrix(cut_size, size, offsetx, W).T)   # (W, cs)

    wh = jnp.asarray(np.stack(wh_list))    # (cutn, cs, H)
    wwt = jnp.asarray(np.stack(wwt_list))  # (cutn, W, cs)

    out = make_cutouts_pallas(x, wh, wwt, cut_size, cutouts_per_step=2)
    out = jax.block_until_ready(out)
    assert out.shape == (cutn * N, C, cut_size, cut_size)
    assert float(out.min()) >= 0.0 and float(out.max()) <= 1.0

    # f32 reference using the same crop/resize matrices (kernel narrows x and
    # wwt to bf16 with f32 accumulation -> small deviation expected).
    ref = jnp.clip(
        jnp.einsum("ish,nchw,iwd->incsd", wh, x, wwt), 0.0, 1.0
    ).reshape(cutn * N, C, cut_size, cut_size)
    max_err = float(jnp.max(jnp.abs(out - ref)))
    assert max_err < 3e-2, max_err

    print("KERNEL_OK")
</pallas_src>

<mosaic_0001>
module attributes {stable_mosaic.version = 11 : i64} {
  func.func @_cutouts_kernel(%arg0: i32, %arg1: memref<128x16xbf16, #tpu.memory_space<vmem>>, %arg2: memref<1x16x16xf32, #tpu.memory_space<vmem>>, %arg3: memref<1x16x16xbf16, #tpu.memory_space<vmem>>, %arg4: memref<1x8x128xf32, #tpu.memory_space<vmem>>, %arg5: memref<128x16xf32, #tpu.memory_space<vmem>>, %arg6: memref<16x64xf32, #tpu.memory_space<vmem>>) attributes {dimension_semantics = [#tpu.dimension_semantics<parallel>], iteration_bounds = array<i64: 2>, scalar_prefetch = 0 : i64, scratch_operands = 2 : i64, tpu.core_type = #tpu.core_type<tc>, window_params = [{pipeline_mode = #tpu.pipeline_mode<synchronous>, transform_indices = @transform_0, window_bounds = array<i64: 128, 16>}, {transform_indices = @transform_1, window_bounds = array<i64: 1, 16, 16>}, {transform_indices = @transform_2, window_bounds = array<i64: 1, 16, 16>}, {transform_indices = @transform_3, window_bounds = array<i64: 1, 8, 128>}]} {
    %c0 = arith.constant 0 : index
    %c0_0 = arith.constant 0 : index
    %0 = vector.load %arg1[%c0, %c0_0] : memref<128x16xbf16, #tpu.memory_space<vmem>>, vector<128x16xbf16>
    %c0_1 = arith.constant 0 : index
    %c0_2 = arith.constant 0 : index
    %c0_3 = arith.constant 0 : index
    %1 = vector.load %arg3[%c0_1, %c0_2, %c0_3] : memref<1x16x16xbf16, #tpu.memory_space<vmem>>, vector<1x16x16xbf16>
    %2 = vector.shape_cast %1 : vector<1x16x16xbf16> to vector<16x16xbf16>
    %cst = arith.constant dense<0.000000e+00> : vector<128x16xf32>
    %3 = tpu.matmul %0, %2, %cst {dimension_numbers = #tpu.dot_dimension_numbers<[1], [0], [0], [1], [0, 0, 1, 1], [], []>} : vector<128x16xbf16>, vector<16x16xbf16>, vector<128x16xf32> -> vector<128x16xf32>
    %c0_4 = arith.constant 0 : index
    %c0_5 = arith.constant 0 : index
    %4 = vector.load %arg5[%c0_4, %c0_5] : memref<128x16xf32, #tpu.memory_space<vmem>>, vector<128x16xf32>
    tpu.vector_store %arg5[%c0_4, %c0_5], %3 {strides = array<i32>} : memref<128x16xf32, #tpu.memory_space<vmem>>, vector<128x16xf32>,
    %c0_6 = arith.constant 0 : index
    %c0_7 = arith.constant 0 : index
    %5 = vector.load %arg5[%c0_6, %c0_7] : memref<128x16xf32, #tpu.memory_space<vmem>>, vector<16x8xf32>
    %c0_8 = arith.constant 0 : index
    %c0_9 = arith.constant 0 : index
    %6 = vector.load %arg6[%c0_8, %c0_9] : memref<16x64xf32, #tpu.memory_space<vmem>>, vector<16x8xf32>
    tpu.vector_store %arg6[%c0_8, %c0_9], %5 {strides = array<i32>} : memref<16x64xf32, #tpu.memory_space<vmem>>, vector<16x8xf32>,
    %c16 = arith.constant 16 : index
    %c0_10 = arith.constant 0 : index
    %7 = vector.load %arg5[%c16, %c0_10] : memref<128x16xf32, #tpu.memory_space<vmem>>, vector<16x8xf32>
    %c0_11 = arith.constant 0 : index
    %c8 = arith.constant 8 : index
    %8 = vector.load %arg6[%c0_11, %c8] : memref<16x64xf32, #tpu.memory_space<vmem>>, vector<16x8xf32>
    tpu.vector_store %arg6[%c0_11, %c8], %7 {strides = array<i32>} : memref<16x64xf32, #tpu.memory_space<vmem>>, vector<16x8xf32>,
    %c32 = arith.constant 32 : index
    %c0_12 = arith.constant 0 : index
    %9 = vector.load %arg5[%c32, %c0_12] : memref<128x16xf32, #tpu.memory_space<vmem>>, vector<16x8xf32>
    %c0_13 = arith.constant 0 : index
    %c16_14 = arith.constant 16 : index
    %10 = vector.load %arg6[%c0_13, %c16_14] : memref<16x64xf32, #tpu.memory_space<vmem>>, vector<16x8xf32>
    tpu.vector_store %arg6[%c0_13, %c16_14], %9 {strides = array<i32>} : memref<16x64xf32, #tpu.memory_space<vmem>>, vector<16x8xf32>,
    %c48 = arith.constant 48 : index
    %c0_15 = arith.constant 0 : index
    %11 = vector.load %arg5[%c48, %c0_15] : memref<128x16xf32, #tpu.memory_space<vmem>>, vector<16x8xf32>
    %c0_16 = arith.constant 0 : index
    %c24 = arith.constant 24 : index
    %12 = vector.load %arg6[%c0_16, %c24] : memref<16x64xf32, #tpu.memory_space<vmem>>, vector<16x8xf32>
    tpu.vector_store %arg6[%c0_16, %c24], %11 {strides = array<i32>} : memref<16x64xf32, #tpu.memory_space<vmem>>, vector<16x8xf32>,
    %c64 = arith.constant 64 : index
    %c0_17 = arith.constant 0 : index
    %13 = vector.load %arg5[%c64, %c0_17] : memref<128x16xf32, #tpu.memory_space<vmem>>, vector<16x8xf32>
    %c0_18 = arith.constant 0 : index
    %c32_19 = arith.constant 32 : index
    %14 = vector.load %arg6[%c0_18, %c32_19] : memref<16x64xf32, #tpu.memory_space<vmem>>, vector<16x8xf32>
    tpu.vector_store %arg6[%c0_18, %c32_19], %13 {strides = array<i32>} : memref<16x64xf32, #tpu.memory_space<vmem>>, vector<16x8xf32>,
    %c80 = arith.constant 80 : index
    %c0_20 = arith.constant 0 : index
    %15 = vector.load %arg5[%c80, %c0_20] : memref<128x16xf32, #tpu.memory_space<vmem>>, vector<16x8xf32>
    %c0_21 = arith.constant 0 : index
    %c40 = arith.constant 40 : index
    %16 = vector.load %arg6[%c0_21, %c40] : memref<16x64xf32, #tpu.memory_space<vmem>>, vector<16x8xf32>
    tpu.vector_store %arg6[%c0_21, %c40], %15 {strides = array<i32>} : memref<16x64xf32, #tpu.memory_space<vmem>>, vector<16x8xf32>,
    %c96 = arith.constant 96 : index
    %c0_22 = arith.constant 0 : index
    %17 = vector.load %arg5[%c96, %c0_22] : memref<128x16xf32, #tpu.memory_space<vmem>>, vector<16x8xf32>
    %c0_23 = arith.constant 0 : index
    %c48_24 = arith.constant 48 : index
    %18 = vector.load %arg6[%c0_23, %c48_24] : memref<16x64xf32, #tpu.memory_space<vmem>>, vector<16x8xf32>
    tpu.vector_store %arg6[%c0_23, %c48_24], %17 {strides = array<i32>} : memref<16x64xf32, #tpu.memory_space<vmem>>, vector<16x8xf32>,
    %c112 = arith.constant 112 : index
    %c0_25 = arith.constant 0 : index
    %19 = vector.load %arg5[%c112, %c0_25] : memref<128x16xf32, #tpu.memory_space<vmem>>, vector<16x8xf32>
    %c0_26 = arith.constant 0 : index
    %c56 = arith.constant 56 : index
    %20 = vector.load %arg6[%c0_26, %c56] : memref<16x64xf32, #tpu.memory_space<vmem>>, vector<16x8xf32>
    tpu.vector_store %arg6[%c0_26, %c56], %19 {strides = array<i32>} : memref<16x64xf32, #tpu.memory_space<vmem>>, vector<16x8xf32>,
    %c0_27 = arith.constant 0 : index
    %c0_28 = arith.constant 0 : index
    %c0_29 = arith.constant 0 : index
    %21 = vector.load %arg2[%c0_27, %c0_28, %c0_29] : memref<1x16x16xf32, #tpu.memory_space<vmem>>, vector<1x8x16xf32>
    %22 = vector.shape_cast %21 : vector<1x8x16xf32> to vector<8x16xf32>
    %c0_30 = arith.constant 0 : index
    %c0_31 = arith.constant 0 : index
    %23 = vector.load %arg6[%c0_30, %c0_31] : memref<16x64xf32, #tpu.memory_space<vmem>>, vector<16x64xf32>
    %cst_32 = arith.constant dense<0.000000e+00> : vector<8x64xf32>
    %24 = tpu.matmul %22, %23, %cst_32 {dimension_numbers = #tpu.dot_dimension_numbers<[1], [0], [0], [1], [0, 0, 1, 1], [], []>} : vector<8x16xf32>, vector<16x64xf32>, vector<8x64xf32> -> vector<8x64xf32>
    %cst_33 = arith.constant 0.000000e+00 : f32
    %cst_34 = arith.constant 1.000000e+00 : f32
    %25 = vector.broadcast %cst_33 : f32 to vector<8x64xf32>
    %26 = arith.maximumf %25, %24 : vector<8x64xf32>
    %27 = vector.broadcast %cst_34 : f32 to vector<8x64xf32>
    %28 = arith.minimumf %27, %26 : vector<8x64xf32>
    %c0_35 = arith.constant 0 : index
    %c0_36 = arith.constant 0 : index
    %c0_37 = arith.constant 0 : index
    %29 = vector.load %arg4[%c0_35, %c0_36, %c0_37] : memref<1x8x128xf32, #tpu.memory_space<vmem>>, vector<1x8x64xf32>
    %30 = vector.shape_cast %29 : vector<1x8x64xf32> to vector<8x64xf32>
    %31 = vector.shape_cast %28 : vector<8x64xf32> to vector<1x8x64xf32>
    tpu.vector_store %arg4[%c0_35, %c0_36, %c0_37], %31 {strides = array<i32>} : memref<1x8x128xf32, #tpu.memory_space<vmem>>, vector<1x8x64xf32>,
    %c0_38 = arith.constant 0 : index
    %c8_39 = arith.constant 8 : index
    %32 = vector.load %arg5[%c0_38, %c8_39] : memref<128x16xf32, #tpu.memory_space<vmem>>, vector<16x8xf32>
    %c0_40 = arith.constant 0 : index
    %c0_41 = arith.constant 0 : index
    %33 = vector.load %arg6[%c0_40, %c0_41] : memref<16x64xf32, #tpu.memory_space<vmem>>, vector<16x8xf32>
    tpu.vector_store %arg6[%c0_40, %c0_41], %32 {strides = array<i32>} : memref<16x64xf32, #tpu.memory_space<vmem>>, vector<16x8xf32>,
    %c16_42 = arith.constant 16 : index
    %c8_43 = arith.constant 8 : index
    %34 = vector.load %arg5[%c16_42, %c8_43] : memref<128x16xf32, #tpu.memory_space<vmem>>, vector<16x8xf32>
    %c0_44 = arith.constant 0 : index
    %c8_45 = arith.constant 8 : index
    %35 = vector.load %arg6[%c0_44, %c8_45] : memref<16x64xf32, #tpu.memory_space<vmem>>, vector<16x8xf32>
    tpu.vector_store %arg6[%c0_44, %c8_45], %34 {strides = array<i32>} : memref<16x64xf32, #tpu.memory_space<vmem>>, vector<16x8xf32>,
    %c32_46 = arith.constant 32 : index
    %c8_47 = arith.constant 8 : index
    %36 = vector.load %arg5[%c32_46, %c8_47] : memref<128x16xf32, #tpu.memory_space<vmem>>, vector<16x8xf32>
    %c0_48 = arith.constant 0 : index
    %c16_49 = arith.constant 16 : index
    %37 = vector.load %arg6[%c0_48, %c16_49] : memref<16x64xf32, #tpu.memory_space<vmem>>, vector<16x8xf32>
    tpu.vector_store %arg6[%c0_48, %c16_49], %36 {strides = array<i32>} : memref<16x64xf32, #tpu.memory_space<vmem>>, vector<16x8xf32>,
    %c48_50 = arith.constant 48 : index
    %c8_51 = arith.constant 8 : index
    %38 = vector.load %arg5[%c48_50, %c8_51] : memref<128x16xf32, #tpu.memory_space<vmem>>, vector<16x8xf32>
    %c0_52 = arith.constant 0 : index
    %c24_53 = arith.constant 24 : index
    %39 = vector.load %arg6[%c0_52, %c24_53] : memref<16x64xf32, #tpu.memory_space<vmem>>, vector<16x8xf32>
    tpu.vector_store %arg6[%c0_52, %c24_53], %38 {strides = array<i32>} : memref<16x64xf32, #tpu.memory_space<vmem>>, vector<16x8xf32>,
    %c64_54 = arith.constant 64 : index
    %c8_55 = arith.constant 8 : index
    %40 = vector.load %arg5[%c64_54, %c8_55] : memref<128x16xf32, #tpu.memory_space<vmem>>, vector<16x8xf32>
    %c0_56 = arith.constant 0 : index
    %c32_57 = arith.constant 32 : index
    %41 = vector.load %arg6[%c0_56, %c32_57] : memref<16x64xf32, #tpu.memory_space<vmem>>, vector<16x8xf32>
    tpu.vector_store %arg6[%c0_56, %c32_57], %40 {strides = array<i32>} : memref<16x64xf32, #tpu.memory_space<vmem>>, vector<16x8xf32>,
    %c80_58 = arith.constant 80 : index
    %c8_59 = arith.constant 8 : index
    %42 = vector.load %arg5[%c80_58, %c8_59] : memref<128x16xf32, #tpu.memory_space<vmem>>, vector<16x8xf32>
    %c0_60 = arith.constant 0 : index
    %c40_61 = arith.constant 40 : index
    %43 = vector.load %arg6[%c0_60, %c40_61] : memref<16x64xf32, #tpu.memory_space<vmem>>, vector<16x8xf32>
    tpu.vector_store %arg6[%c0_60, %c40_61], %42 {strides = array<i32>} : memref<16x64xf32, #tpu.memory_space<vmem>>, vector<16x8xf32>,
    %c96_62 = arith.constant 96 : index
    %c8_63 = arith.constant 8 : index
    %44 = vector.load %arg5[%c96_62, %c8_63] : memref<128x16xf32, #tpu.memory_space<vmem>>, vector<16x8xf32>
    %c0_64 = arith.constant 0 : index
    %c48_65 = arith.constant 48 : index
    %45 = vector.load %arg6[%c0_64, %c48_65] : memref<16x64xf32, #tpu.memory_space<vmem>>, vector<16x8xf32>
    tpu.vector_store %arg6[%c0_64, %c48_65], %44 {strides = array<i32>} : memref<16x64xf32, #tpu.memory_space<vmem>>, vector<16x8xf32>,
    %c112_66 = arith.constant 112 : index
    %c8_67 = arith.constant 8 : index
    %46 = vector.load %arg5[%c112_66, %c8_67] : memref<128x16xf32, #tpu.memory_space<vmem>>, vector<16x8xf32>
    %c0_68 = arith.constant 0 : index
    %c56_69 = arith.constant 56 : index
    %47 = vector.load %arg6[%c0_68, %c56_69] : memref<16x64xf32, #tpu.memory_space<vmem>>, vector<16x8xf32>
    tpu.vector_store %arg6[%c0_68, %c56_69], %46 {strides = array<i32>} : memref<16x64xf32, #tpu.memory_space<vmem>>, vector<16x8xf32>,
    %c0_70 = arith.constant 0 : index
    %c8_71 = arith.constant 8 : index
    %c0_72 = arith.constant 0 : index
    %48 = vector.load %arg2[%c0_70, %c8_71, %c0_72] : memref<1x16x16xf32, #tpu.memory_space<vmem>>, vector<1x8x16xf32>
    %49 = vector.shape_cast %48 : vector<1x8x16xf32> to vector<8x16xf32>
    %c0_73 = arith.constant 0 : index
    %c0_74 = arith.constant 0 : index
    %50 = vector.load %arg6[%c0_73, %c0_74] : memref<16x64xf32, #tpu.memory_space<vmem>>, vector<16x64xf32>
    %cst_75 = arith.constant dense<0.000000e+00> : vector<8x64xf32>
    %51 = tpu.matmul %49, %50, %cst_75 {dimension_numbers = #tpu.dot_dimension_numbers<[1], [0], [0], [1], [0, 0, 1, 1], [], []>} : vector<8x16xf32>, vector<16x64xf32>, vector<8x64xf32> -> vector<8x64xf32>
    %cst_76 = arith.constant 0.000000e+00 : f32
    %cst_77 = arith.constant 1.000000e+00 : f32
    %52 = vector.broadcast %cst_76 : f32 to vector<8x64xf32>
    %53 = arith.maximumf %52, %51 : vector<8x64xf32>
    %54 = vector.broadcast %cst_77 : f32 to vector<8x64xf32>
    %55 = arith.minimumf %54, %53 : vector<8x64xf32>
    %c0_78 = arith.constant 0 : index
    %c0_79 = arith.constant 0 : index
    %c64_80 = arith.constant 64 : index
    %56 = vector.load %arg4[%c0_78, %c0_79, %c64_80] : memref<1x8x128xf32, #tpu.memory_space<vmem>>, vector<1x8x64xf32>
    %57 = vector.shape_cast %56 : vector<1x8x64xf32> to vector<8x64xf32>
    %58 = vector.shape_cast %55 : vector<8x64xf32> to vector<1x8x64xf32>
    tpu.vector_store %arg4[%c0_78, %c0_79, %c64_80], %58 {strides = array<i32>} : memref<1x8x128xf32, #tpu.memory_space<vmem>>, vector<1x8x64xf32>,
    return
  }
  func.func @transform_0(%arg0: i32) -> (i32, i32) {
    %c0_i32 = arith.constant 0 : i32
    %c0_i32_0 = arith.constant 0 : i32
    %c0_i32_1 = arith.constant 0 : i32
    return %c0_i32, %c0_i32_0 : i32, i32
  }
  func.func @transform_1(%arg0: i32) -> (i32, i32, i32) {
    %c0_i32 = arith.constant 0 : i32
    %c0_i32_0 = arith.constant 0 : i32
    %c0_i32_1 = arith.constant 0 : i32
    return %arg0, %c0_i32, %c0_i32_0 : i32, i32, i32
  }
  func.func @transform_2(%arg0: i32) -> (i32, i32, i32) {
    %c0_i32 = arith.constant 0 : i32
    %c0_i32_0 = arith.constant 0 : i32
    %c0_i32_1 = arith.constant 0 : i32
    return %arg0, %c0_i32, %c0_i32_0 : i32, i32, i32
  }
  func.func @transform_3(%arg0: i32) -> (i32, i32, i32) {
    %c0_i32 = arith.constant 0 : i32
    %c0_i32_0 = arith.constant 0 : i32
    %c0_i32_1 = arith.constant 0 : i32
    return %arg0, %c0_i32, %c0_i32_0 : i32, i32, i32
  }
}

</mosaic_0001>

<bundles_post_ra>
// kernel: tpu_custom_call.1
= control target key start
LH: loop header
LB: loop body
LE: loop exit
PB: predicated region body
PF: predicated region fallthrough
CT: control target
= control target key end

     0   :  { %8 = vsyncpa [#allocation5], 0  ;;  %s1290_s0 = inlined_call_operand.vmem [shape: bf16[128,16], index: 0, kind: input, shape index: {}]   ;;  %s1291_s1 = inlined_call_operand.vmem [shape: f32[2,16,16], index: 1, kind: input, shape index: {}]   ;;  %s1292_s2 = inlined_call_operand.vmem [shape: bf16[2,16,16], index: 2, kind: input, shape index: {}]   ;;  %s1293_s3 = inlined_call_operand.hbm [shape: f32[2,8,128], index: 3, kind: output, shape index: {}]  }
   0x1   :  { %10 = vsyncpa [#allocation5 + $0x1], 0  ;;  %s1071_s12 = smov 0   ;;  %s1073_s13 = smov 0  }
   0x2   :  { %s1075_s14 = smov 0   ;;  %s1077_s15 = smov 0  }
   0x3 LB: > { %s1092_s16 = sadd.s32 4294967295, %s1036_s15   ;;  %s825_s17 = sadd.s32 4294967294, %s1036_s15   ;;  %s1036_s15 = sphi %s1077_s15, %s1299_s15   ;;  %s1032_s14 = sphi %s1075_s14, %s1298_s14   ;;  %s1028_s13 = sphi %s1073_s13, %s1297_s13   ;;  %s1024_s12 = sphi %s1071_s12, %s1296_s12  }
   0x4   : > { %s1096_s18 = sadd.s32 1, %s1036_s15   ;;  %s96_s19 = sadd.s32 1, %s1032_s14 }
   0x5   : > { %s93_s20 = ssub.s32 %s1036_s15, %s1096_s18  ;;  %p106_p0 = scmp.ne.s32.totalorder %s1032_s14, %s1028_s13 }
   0x6   : > { %p94_p1 = scmp.eq.s32.totalorder %s93_s20, 0  ;;  %p107_p2 = scmp.eq.s32.totalorder %s1092_s16, 1 }
   0x7   : > { %p112_p3 = scmp.ne.s32.totalorder %s1028_s13, %s1024_s12  ;;  %p113_p4 = scmp.eq.s32.totalorder %s825_s17, 1 }
   0x8   : > { %s1107_s21 = scalar_select %p94_p1, %s1032_s14, %s96_s19  }
   0x9   : > { %p1109_p5 = por %p107_p2, %p106_p0  ;;  %p1113_p6 = por %p113_p4, %p112_p3 }
   0xa   : > { %p828_p7 = scmp.ge.s32.totalorder %s1036_s15, 1  ;;  %p150_p8 = scmp.lt.s32.totalorder %s1036_s15, 3 }
   0xc   : > { %p151_p9 = pnand %p828_p7, %p150_p8 }
   0xd   : > { %p179_p10 = scmp.lt.s32.totalorder (!%p151_p9), %s1092_s16, 1  ;;  %v966_v0 = vld [vmem:[%s1290_s0] sm:$0xff] (!%p151_p9)   ;;  %vm254_vm0 = vcmask (!%p151_p9), 130048   ;;  %v967_v1 = vld [vmem:[%s1290_s0 + $0x30] sm:$0xff] (!%p151_p9)   ;;  %v968_v3 = vld [vmem:[%s1290_s0 + $0x8] sm:$0xff] (!%p151_p9)   ;;  %vm394_vm1 = vcmask (!%p151_p9), 64512  }
   0xe   : > { %154 = sbr.rel (%p151_p9) target bundleno = 782 (0x30e), region = 32  ;;  %876 = vmatprep.mubr.msk.bf16.mxu0 (!%p151_p9), %vm254_vm0, %v966_v0  ;;  %888 = vmatprep.mubr.msk.bf16.mxu1 (!%p151_p9), %vm254_vm0, %v967_v1  ;;  %v969_v4 = vld [vmem:[%s1290_s0 + $0x38] sm:$0xff] (!%p151_p9)   ;;  %v970_v5 = vld [vmem:[%s1290_s0 + $0x10] sm:$0xff] (!%p151_p9)   ;;  %v972_v7 = vld [vmem:[%s1290_s0 + $0x20] sm:$0xff] (!%p151_p9)   ;;  %s1038_s27 = smov (!%p151_p9), 8   ;;  %v1046_v41 = vmov (!%p151_p9), 0.0|0.0  }
   0xf   : > { %v971_v6 = vld [vmem:[%s1290_s0 + $0x18] sm:$0xff] (!%p151_p9)   ;;  %v973_v8 = vld [vmem:[%s1290_s0 + $0x28] sm:$0xff] (!%p151_p9)   ;;  %s1040_s30 = smov (!%p151_p9), 48   ;;  %s1041_s4 = smov (!%p151_p9), 120   ;;  %vm1047_vm2 = vmmov (!%p151_p9), 0   ;;  %v1048_v42 = vmov (!%p151_p9), 0.0  }
  0x10   : > { %s1043_s6 = smov (!%p151_p9), 24   ;;  %s1044_s7 = smov (!%p151_p9), 40   ;;  %vm407_vm3 = vcmask (!%p151_p9), 130112   ;;  %vm420_vm4 = vcmask (!%p151_p9), 195712   ;;  %vm433_vm5 = vcmask (!%p151_p9), 261312   ;;  %vm446_vm6 = vcmask (!%p151_p9), 326912  }
  0x11   : > { %s1045_s8 = smov (!%p151_p9), 32   ;;  %vm459_vm7 = vcmask (!%p151_p9), 392512   ;;  %vm472_vm8 = vcmask (!%p151_p9), 458112   ;;  %vm485_vm9 = vcmask (!%p151_p9), 523712   ;;  %vm566_vm10 = vcmask (!%p151_p9), 523264   ;;  %s1049_s24 = smov (!%p151_p9), 64  }
  0x12   : > { %s854_s25 = sshll.u32 (!%p151_p9), %s1092_s16, 7  ;;  %vm738_vm11 = vcmask (!%p151_p9), 1048064  }
  0x15   : > { %s1127_s28 = scalar_select %p179_p10, %s1092_s16, 1 }
  0x16   : > { %s1050_s16 = smov [#allocation4]  }
  0x17   : > { %s858_s29 = sshll.u32 %s1127_s28, 3  ;;  %s857_s9 = sshll.u32 %s1127_s28, 4 }
  0x18   : > { %s188_s5 = scalar_lea.vmem %s1292_s2, %s858_s29  ;;  %s1039_s29 = smov 56  }
  0x19   : > { %v965_v2 = vld [vmem:[%s188_s5] sm:$0xff]   ;;  %s1042_s5 = smov 16   ;;  %s183_s17 = scalar_lea.vmem %s1291_s1, %s857_s9 }
  0x1a   : > { %874 = vmatprep.subr.bf16.mxu0 %v965_v2  ;;  %912 = vmatprep.subr.bf16.mxu1 %v965_v2  ;;  %s176_s28 = sand.u32 1, %s1028_s13  }
  0x1b   : > { %875 = vmatpush3.bf16.msra.mxu0 %v965_v2  ;;  %913 = vmatpush3.bf16.msra.mxu1 %v965_v2  ;;  %s829_s19 = sshll.u32 %s176_s28, 3 }
  0x1c   : > { %906 = vmatprep.subr.bf16.mxu1 %v1046_v41  ;;  %s178_s20 = scalar_lea.vmem [#allocation4], %s829_s19 }
  0x1d   : > { %s754_s26 = sshll.u32 %s178_s20, 4  ;;  %s1250_s26 = int_to_ptr.vmem [resolvable:$true] %s754_s26 }
  0x1e   : > { %877 = vmatmul.mubr.msk.bf16.vlgmr.msra.gmra.mrb[0].mxu0 %vm254_vm0, %v968_v3  ;;  %889 = vmatmul.mubr.msk.bf16.vlgmr.msra.gmra.mrb[0].mxu1 %vm254_vm0, %v969_v4 }
  0x1f   : > { %880 = vmatprep.mubr.msk.bf16.mxu0 %vm254_vm0, %v970_v5  ;;  %896 = vmatprep.mubr.msk.f32.mxu1 %vm1047_vm2, %v1048_v42 }
  0x26   : > { %881 = vmatmul.mubr.msk.bf16.gmra.mrb[4].mxu0 %vm254_vm0, %v971_v6 }
  0x27   : > { %884 = vmatprep.mubr.msk.bf16.mxu0 %vm254_vm0, %v972_v7  ;;  %v488_v7 = vld [vmem:[%s183_s17] sm:$0xff] }
  0x2e   : > { %885 = vmatmul.mubr.msk.bf16.gmra.mrb[8].mxu0 %vm254_vm0, %v973_v8 }
  0xf1   : > { %v878_v9 = vpop.f32.mrb[0].mxu0  ;;  %v890_v10 = vpop.f32.mrb[0].mxu1 }
  0xf2   : > { %378 = vst.msk [vmem:[#allocation2 + $0x10] sm:$0xff] %vm254_vm0, %v878_v9  ;;  %390 = vst.msk [vmem:[#allocation2 + $0x70] sm:$0xff] %vm254_vm0, %v890_v10  ;;  %v313_v11 = vpop.f32.mrb[1].mxu0  ;;  %v361_v12 = vpop.f32.mrb[1].mxu1 }
  0xf3   : > { %376 = vst.msk [vmem:[#allocation2] sm:$0xff] %vm254_vm0, %v313_v11  ;;  %388 = vst.msk [vmem:[#allocation2 + $0x60] sm:$0xff] %vm254_vm0, %v361_v12  ;;  %v879_v13 = vpop.f32.mrb[2].mxu0  ;;  %v891_v14 = vpop.f32.mrb[2].mxu1 }
  0xf4   : > { %379 = vst.msk [vmem:[#allocation2 + $0x18] sm:$0xff] %vm254_vm0, %v879_v13  ;;  %391 = vst.msk [vmem:[#allocation2 + $0x78] sm:$0xff] %vm254_vm0, %v891_v14  ;;  %v316_v15 = vpop.f32.mrb[3].mxu0  ;;  %v364_v16 = vpop.f32.mrb[3].mxu1  ;;  %v656_v14 = vld [vmem:[%s183_s17 + $0x8] sm:$0xff] }
  0xf5   : > { %377 = vst.msk [vmem:[#allocation2 + $0x8] sm:$0xff] %vm254_vm0, %v316_v15  ;;  %389 = vst.msk [vmem:[#allocation2 + $0x68] sm:$0xff] %vm254_vm0, %v364_v16 }
  0xf9   : > { %v1167_v17 = vld [vmem:[#allocation2 + $0x10] sm:$0xff]  ;;  %v882_v18 = vpop.f32.mrb[4].mxu0 }
  0xfa   : > { %401 = vrot.lane.b32.xlu0 %v1167_v17, %s1038_s27  ;;  %382 = vst.msk [vmem:[#allocation2 + $0x30] sm:$0xff] %vm254_vm0, %v882_v18  ;;  %v329_v19 = vpop.f32.mrb[5].mxu0  ;;  %v568_v20 = vld [vmem:[#allocation2] sm:$0xff]  ;;  %v475_v25 = vld [vmem:[#allocation2 + $0x70] sm:$0xff] }
  0xfb   : > { %v1172_v21 = vld [vmem:[#allocation2 + $0x78] sm:$0xff]  ;;  %380 = vst.msk [vmem:[#allocation2 + $0x20] sm:$0xff] %vm254_vm0, %v329_v19  ;;  %v883_v22 = vpop.f32.mrb[6].mxu0  ;;  %v462_v27 = vld [vmem:[#allocation2 + $0x60] sm:$0xff] }
  0xfc   : > { %395 = vst.msk [vmem:[#allocation3] sm:$0xff] %vm394_vm1, %v568_v20  ;;  %481 = vrot.lane.b32.xlu1 %v1172_v21, %s1039_s29  ;;  %v332_v23 = vpop.f32.mrb[7].mxu0  ;;  %v569_v24 = vld [vmem:[#allocation2 + $0x8] sm:$0xff]  ;;  %v1186_v33 = vld [vmem:[#allocation2 + $0x18] sm:$0xff] }
  0xfd   : > { %383 = vst.msk [vmem:[#allocation2 + $0x38] sm:$0xff] %vm254_vm0, %v883_v22  ;;  %381 = vst.msk [vmem:[#allocation2 + $0x28] sm:$0xff] %vm254_vm0, %v332_v23  ;;  %v463_v26 = vld [vmem:[#allocation2 + $0x68] sm:$0xff] }
  0xfe   : > { %396 = vst.msk [vmem:[#allocation3 + $0x8] sm:$0xff] %vm394_vm1, %v569_v24  ;;  %479 = vrot.lane.b32.xlu0 %v475_v25, %s1039_s29 }
 0x100   : > { %468 = vrot.lane.b32.xlu1 %v463_v26, %s1040_s30 }
 0x101   : > { %v886_v28 = vpop.f32.mrb[8].mxu0  ;;  %v423_v35 = vld [vmem:[#allocation2 + $0x30] sm:$0xff] }
 0x102   : > { %466 = vrot.lane.b32.xlu0 %v462_v27, %s1040_s30  ;;  %386 = vst.msk [vmem:[#allocation2 + $0x50] sm:$0xff] %vm254_vm0, %v886_v28  ;;  %v345_v29 = vpop.f32.mrb[9].mxu0  ;;  %v410_v32 = vld [vmem:[#allocation2 + $0x20] sm:$0xff] }
 0x103   : > { %384 = vst.msk [vmem:[#allocation2 + $0x40] sm:$0xff] %vm254_vm0, %v345_v29  ;;  %v887_v30 = vpop.f32.mrb[10].mxu0 }
 0x104   : > { %574 = vrot.lane.b32.xlu1 %v569_v24, %s1041_s4  ;;  %387 = vst.msk [vmem:[#allocation2 + $0x58] sm:$0xff] %vm254_vm0, %v887_v30  ;;  %v348_v31 = vpop.f32.mrb[11].mxu0  ;;  %v424_v34 = vld [vmem:[#allocation2 + $0x38] sm:$0xff]  ;;  %v411_v36 = vld [vmem:[#allocation2 + $0x28] sm:$0xff] }
 0x105   : > { %385 = vst.msk [vmem:[#allocation2 + $0x48] sm:$0xff] %vm254_vm0, %v348_v31 }
 0x106   : > { %572 = vrot.lane.b32.xlu0 %v568_v20, %s1041_s4  ;;  %s741_s4 = scalar_lea.sflag [#allocation5], %s176_s28 }
 0x108   : > { %414 = vrot.lane.b32.xlu1 %v410_v32, %s1042_s5 }
 0x109   : > { %v449_v37 = vld [vmem:[#allocation2 + $0x50] sm:$0xff] }
 0x10a   : > { %403 = vrot.lane.b32.xlu0 %v1186_v33, %s1038_s27  ;;  %v436_v39 = vld [vmem:[#allocation2 + $0x40] sm:$0xff] }
 0x10b   : > { %v450_v38 = vld [vmem:[#allocation2 + $0x58] sm:$0xff] }
 0x10c   : > { %429 = vrot.lane.b32.xlu1 %v424_v34, %s1043_s6  ;;  %v437_v40 = vld [vmem:[#allocation2 + $0x48] sm:$0xff] }
 0x10e   : > { %427 = vrot.lane.b32.xlu0 %v423_v35, %s1043_s6 }
 0x110   : > { %416 = vrot.lane.b32.xlu1 %v411_v36, %s1042_s5 }
 0x112   : > { %588 = vrot.lane.b32.xlu0 %v410_v32, %s1038_s27 }
 0x114   : > { %590 = vrot.lane.b32.xlu1 %v411_v36, %s1038_s27 }
 0x116   : > { %453 = vrot.lane.b32.xlu0 %v449_v37, %s1044_s7 }
 0x118   : > { %455 = vrot.lane.b32.xlu1 %v450_v38, %s1044_s7 }
 0x11a   : > { %440 = vrot.lane.b32.xlu0 %v436_v39, %s1045_s8 }
 0x11c   : > { %442 = vrot.lane.b32.xlu1 %v437_v40, %s1045_s8 }
 0x11e   : > { %600 = vrot.lane.b32.xlu0 %v423_v35, %s1042_s5 }
 0x120   : > { %602 = vrot.lane.b32.xlu1 %v424_v34, %s1042_s5  ;;  %s974_s5 = scalar_lea.vmem %s1250_s26, 128 }
 0x121   : > { %p975_p11 = scmp.ne.s32.totalorder %s1250_s26, %s974_s5 }
 0x122   : > { %612 = vrot.lane.b32.xlu0 %v436_v39, %s1043_s6 }
 0x123   : > { %p976_p12 = pnand %p975_p11, %p1109_p5 }
 0x124   : > { %626 = vrot.lane.b32.xlu1 %v450_v38, %s1045_s8 }
 0x125   : > { %p977_p13 = pneg %p976_p12 }
 0x126   : > { %624 = vrot.lane.b32.xlu0 %v449_v37, %s1045_s8 }
 0x128   : > { %638 = vrot.lane.b32.xlu1 %v463_v26, %s1044_s7 }
 0x12a   : > { %636 = vrot.lane.b32.xlu0 %v462_v27, %s1044_s7 }
 0x12c   : > { %614 = vrot.lane.b32.xlu1 %v437_v40, %s1043_s6  ;;  %s978_s6 = sshll.u32 %s1050_s16, 4  ;;  %s979_s6 = int_to_ptr.vmem [resolvable:$false] %s978_s6 }
 0x12d   : > { %s980_s7 = scalar_lea.vmem %s979_s6, 256  ;;  %p981_p0 = scmp.lt.s32.totalorder %s1250_s26, %s979_s6 }
 0x12e   : > { %648 = vrot.lane.b32.xlu0 %v475_v25, %s1040_s30  ;;  %p982_p1 = scmp.lt.s32.totalorder %s980_s7, %s974_s5 }
 0x130   : > { %650 = vrot.lane.b32.xlu1 %v1172_v21, %s1040_s30  ;;  %s1248_s30 = scalar_lea.hbm %s1293_s3, %s854_s25  ;;  %p983_p2 = por %p982_p1, %p981_p0 }
 0x132   : > { %p984_p3 = pnand %p983_p2, %p977_p13 }
 0x16c   : > { %v402_v43 = vpop.permute.xlu0 %401 }
 0x16d   : > { %408 = vst.msk [vmem:[#allocation3] sm:$0xff] %vm407_vm3, %v402_v43 }
 0x16e   : > { %v482_v44 = vpop.permute.xlu1 %481 }
 0x170   : > { %v480_v45 = vpop.permute.xlu0 %479 }
 0x172   : > { %v469_v46 = vpop.permute.xlu1 %468 }
 0x174   : > { %v467_v47 = vpop.permute.xlu0 %466 }
 0x176   : > { %v575_v48 = vpop.permute.xlu1 %574 }
 0x178   : > { %v573_v49 = vpop.permute.xlu0 %572 }
 0x17a   : > { %v415_v50 = vpop.permute.xlu1 %414 }
 0x17b   : > { %421 = vst.msk [vmem:[#allocation3] sm:$0xff] %vm420_vm4, %v415_v50 }
 0x17c   : > { %v404_v51 = vpop.permute.xlu0 %403 }
 0x17d   : > { %409 = vst.msk [vmem:[#allocation3 + $0x8] sm:$0xff] %vm407_vm3, %v404_v51 }
 0x17e   : > { %v430_v52 = vpop.permute.xlu1 %429 }
 0x180   : > { %v428_v53 = vpop.permute.xlu0 %427 }
 0x181   : > { %434 = vst.msk [vmem:[#allocation3] sm:$0xff] %vm433_vm5, %v428_v53 }
 0x182   : > { %v417_v54 = vpop.permute.xlu1 %416 }
 0x183   : > { %422 = vst.msk [vmem:[#allocation3 + $0x8] sm:$0xff] %vm420_vm4, %v417_v54 }
 0x184   : > { %435 = vst.msk [vmem:[#allocation3 + $0x8] sm:$0xff] %vm433_vm5, %v430_v52  ;;  %v589_v55 = vpop.permute.xlu0 %588 }
 0x186   : > { %v591_v56 = vpop.permute.xlu1 %590 }
 0x188   : > { %v454_v57 = vpop.permute.xlu0 %453 }
 0x18a   : > { %v456_v58 = vpop.permute.xlu1 %455 }
 0x18c   : > { %v441_v59 = vpop.permute.xlu0 %440 }
 0x18d   : > { %447 = vst.msk [vmem:[#allocation3] sm:$0xff] %vm446_vm6, %v441_v59 }
 0x18e   : > { %460 = vst.msk [vmem:[#allocation3] sm:$0xff] %vm459_vm7, %v454_v57  ;;  %v443_v60 = vpop.permute.xlu1 %442 }
 0x18f   : > { %448 = vst.msk [vmem:[#allocation3 + $0x8] sm:$0xff] %vm446_vm6, %v443_v60 }
 0x190   : > { %473 = vst.msk [vmem:[#allocation3] sm:$0xff] %vm472_vm8, %v467_v47  ;;  %v601_v61 = vpop.permute.xlu0 %600 }
 0x191   : > { %461 = vst.msk [vmem:[#allocation3 + $0x8] sm:$0xff] %vm459_vm7, %v456_v58 }
 0x192   : > { %486 = vst.msk [vmem:[#allocation3] sm:$0xff] %vm485_vm9, %v480_v45  ;;  %v603_v62 = vpop.permute.xlu1 %602 }
 0x193   : > { %474 = vst.msk [vmem:[#allocation3 + $0x8] sm:$0xff] %vm472_vm8, %v469_v46 }
 0x194   : > { %487 = vst.msk [vmem:[#allocation3 + $0x8] sm:$0xff] %vm485_vm9, %v482_v44  ;;  %v613_v63 = vpop.permute.xlu0 %612 }
 0x196   : > { %v627_v0 = vpop.permute.xlu1 %626 }
 0x198   : > { %v625_v2 = vpop.permute.xlu0 %624 }
 0x199   : > { %v489_v1 = vld [vmem:[#allocation3] sm:$0xff] }
 0x19a   : > { %578 = vst.msk [vmem:[#allocation3] sm:$0xff] %vm394_vm1, %v573_v49  ;;  %v639_v4 = vpop.permute.xlu1 %638 }
 0x19b   : > { %582 = vst.msk [vmem:[#allocation3] sm:$0xff] %vm407_vm3, %v1167_v17  ;;  %v490_v3 = vld [vmem:[#allocation3 + $0x8] sm:$0xff] }
 0x19c   : > { %594 = vst.msk [vmem:[#allocation3] sm:$0xff] %vm420_vm4, %v589_v55  ;;  %v907_v5 = vpack.c.bf16 %v490_v3, %v489_v1  ;;  %v637_v6 = vpop.permute.xlu0 %636 }
 0x19d   : > { %579 = vst.msk [vmem:[#allocation3 + $0x8] sm:$0xff] %vm394_vm1, %v575_v48 }
 0x19e   : > { %606 = vst.msk [vmem:[#allocation3] sm:$0xff] %vm433_vm5, %v601_v61  ;;  %908 = vmatpush3.bf16.msra.mxu1 %v907_v5  ;;  %v615_v8 = vpop.permute.xlu1 %614 }
 0x19f   : > { %583 = vst.msk [vmem:[#allocation3 + $0x8] sm:$0xff] %vm407_vm3, %v1186_v33  ;;  %909 = vmatprep.subr.bf16.mxu1 %v1046_v41 }
 0x1a0   : > { %595 = vst.msk [vmem:[#allocation3 + $0x8] sm:$0xff] %vm420_vm4, %v591_v56  ;;  %v649_v9 = vpop.permute.xlu0 %648 }
 0x1a1   : > { %618 = vst.msk [vmem:[#allocation3] sm:$0xff] %vm446_vm6, %v613_v63  ;;  %897 = vmatmul.mubr.msk.f32.vlgmr.msra.gmra.mrb[4].mxu1 %vm254_vm0, %v488_v7 }
 0x1a2   : > { %607 = vst.msk [vmem:[#allocation3 + $0x8] sm:$0xff] %vm433_vm5, %v603_v62  ;;  %903 = vmatprep.mubr.msk.f32.mxu1 %vm1047_vm2, %v1048_v42  ;;  %v651_v10 = vpop.permute.xlu1 %650 }
 0x1a3   : > { %630 = vst.msk [vmem:[#allocation3] sm:$0xff] %vm459_vm7, %v625_v2 }
 0x1a4   : > { %642 = vst.msk [vmem:[#allocation3] sm:$0xff] %vm472_vm8, %v637_v6 }
 0x1a5   : > { %619 = vst.msk [vmem:[#allocation3 + $0x8] sm:$0xff] %vm446_vm6, %v615_v8 }
 0x1a6   : > { %631 = vst.msk [vmem:[#allocation3 + $0x8] sm:$0xff] %vm459_vm7, %v627_v0 }
 0x1a7   : > { %643 = vst.msk [vmem:[#allocation3 + $0x8] sm:$0xff] %vm472_vm8, %v639_v4 }
 0x1a8   : > { %654 = vst.msk [vmem:[#allocation3] sm:$0xff] %vm485_vm9, %v649_v9  ;;  %655 = vst.msk [vmem:[#allocation3 + $0x8] sm:$0xff] %vm485_vm9, %v651_v10 }
 0x1af   : > { %v657_v11 = vld [vmem:[#allocation3] sm:$0xff]  ;;  %v658_v12 = vld [vmem:[#allocation3 + $0x8] sm:$0xff] }
 0x1b0   : > { %v910_v13 = vpack.c.bf16 %v658_v12, %v657_v11 }
 0x1b2   : > { %911 = vmatpush3.bf16.msra.mxu1 %v910_v13 }
 0x1b5   : > { %904 = vmatmul.mubr.msk.f32.vlgmr.msra.gmra.mrb[6].mxu1 %vm254_vm0, %v656_v14 }
 0x274   : > { %v560_v15 = vpop.f32.mrb[4].mxu1 }
 0x275   : > { %v564_v16 = vmax.f32 %v560_v15, 0.0  ;;  %v898_v17 = vpop.f32.mrb[5].mxu1 }
 0x277   : > { %v565_v18 = vmin.f32 %v564_v16, 1.0 }
 0x279   : > { %567 = vst.msk [vmem:[%s178_s20] sm:$0xff] %vm566_vm10, %v565_v18 }
 0x288   : > { %v728_v19 = vpop.f32.mrb[6].mxu1 }
 0x289   : > { %v732_v20 = vmax.f32 %v728_v19, 0.0  ;;  %v905_v21 = vpop.f32.mrb[7].mxu1 }
 0x28b   : > { %v733_v22 = vmin.f32 %v732_v20, 1.0 }
 0x28d   : > { %735 = vrot.lane.b32.xlu0 %v733_v22, %s1049_s24 }
 0x2ff   : > { %v736_v23 = vpop.permute.xlu0 %735 }
 0x300   : > { %739 = vst.msk [vmem:[%s178_s20] sm:$0xff] %vm738_vm11, %v736_v23 }
 0x301   : > { %987 = shalt.err (!%p984_p3)
}
 0x302   : > { %s988_s8 = scalar_lea.hbm %s1248_s30, 128  ;;  %s992_s11 = scalar_lea.hbm %s1293_s3, 256 }
 0x303   : > { %p989_p4 = scmp.ne.s32.totalorder %s1248_s30, %s988_s8  ;;  %p993_p9 = scmp.lt.u32.totalorder %s1248_s30, %s1293_s3 }
 0x304   : > { %p994_p10 = scmp.lt.u32.totalorder %s992_s11, %s988_s8  ;;  %p996_p12 = scmp.lt.u32.totalorder %s988_s8, %s1248_s30 }
 0x305   : > { %p990_p7 = pnand %p989_p4, %p1109_p5 }
 0x306   : > { %p995_p11 = por %p994_p10, %p993_p9 }
 0x307   : > { %p991_p8 = pneg %p990_p7 }
 0x308   : > { %p997_p13 = por %p996_p12, %p995_p11 }
 0x30a   : > { %p998_p0 = pnand %p997_p13, %p991_p8 }
 0x30c   : > { %1001 = shalt.err (!%p998_p0)
}
 0x30d   : > { %914 = dma.vmem_to_hbm [thread:$0]  (%p1109_p5), %s1250_s26, 128, %s1248_s30, %s741_s4  }
 0x30e PF: > { %p920_p1 = scmp.ge.s32.totalorder %s1036_s15, 2  ;;  %s766_s19 = sand.u32 1, %s1024_s12  }
 0x30f   : > { %s767_s20 = scalar_lea.sflag [#allocation5], %s766_s19 }
 0x310   : > { %p917_p2 = pnand %p920_p1, %p1113_p6 }
 0x312   : > { %1019 = dma.done.wait (!%p917_p2), %s767_s20, 128  }
 0x313   : > { %1021 = vsyncadd (!%p917_p2), %s767_s20, 4294967168  ;;  %p13_p3 = scmp.ge.s32.totalorder %s1096_s18, 4   ;;  %s1296_s12 = smov %s1028_s13 }
 0x314   : > { %s1297_s13 = smov %s1032_s14  ;;  %s1298_s14 = smov %s1107_s21 }
 0x315   : > { %s1299_s15 = smov %s1096_s18  ;;  %15 = sbr.rel (!%p13_p3) target bundleno = 3 (0x3), region = 70 }
 0x31c   :  { %772 = vsyncpa [#allocation5], 1 }
 0x31d   :  { %774 = vsyncpa [#allocation5 + $0x1], 1 }

</bundles_post_ra>
